<compile_context>
chip_gen: v6e
topology: v6e:2x2x1
jax: 0.10.0
libtpu: 0.0.40
codegen_flags: <defaults>
</compile_context>

<pallas_src>
import jax
import jax.numpy as jnp
import numpy as np
from jax.experimental import pallas as pl
from jax.experimental.pallas import tpu as pltpu


def _round_up(x, m):
    return (x + m - 1) // m * m


def sgns_kernel(vecs_ref, out_ref):
    # vecs_ref: (K, D, TB) f32 gathered embeddings; D on sublanes, batch on lanes.
    # out_ref : (1, TB)    f32 lane-dense score slab (lanes == batch rows).
    K = vecs_ref.shape[0]
    acc = vecs_ref[0]                          # (D, TB) -- full-tile VPU ops
    for k in range(1, K):                      # static unroll over tiny K
        acc = acc * vecs_ref[k]
    # Sublane (second-minor) reduce over D; lanes already hold the batch, so
    # this directly yields the lane-dense (1, TB) slab -- no XLU relayout.
    out_ref[...] = jnp.sum(acc, axis=0, keepdims=True)


def sgns_forward(weights, vii, *, tb=8192):
    """weights: (V, D) f32 embedding table; vii: (B, K) int32 index lists.

    Returns (B,) f32 where out[i] = sum_d prod_k weights[vii[i, k], d].
    """
    B, K = vii.shape
    V, D = weights.shape

    # ---- Tile / grid selection -------------------------------------------
    # Multi-step grids require the output block's lane dim (tb) to be a
    # multiple of 128; single-step grids use the full array as the block, so
    # any B is legal there (masked stores for B < 128 are accepted).
    if B <= tb:
        if B >= 2048:
            # Big-enough batch in one default tile: split into >=2 tiles so the
            # "parallel" grid axis can shard across both v7x TensorCores.
            tb = _round_up(pl.cdiv(B, 2), 128)
        else:
            tb = B                      # single grid step, block == full array
    else:
        tb = max(128, (tb // 128) * 128)  # clamp caller tb to the lane rule

    Bp = _round_up(B, tb)
    if Bp != B:
        # Pad with index 0 (always valid); padded rows are sliced off below.
        vii = jnp.pad(vii, ((0, Bp - B), (0, 0)))

    # ---- Gather in (K, D, Bp) layout --------------------------------------
    # TODO(synk): fuse this gather into the kernel at production batch sizes
    # (table fits VMEM on all generations); XLA handles it fine at these shapes.
    vecs_t = jnp.take(weights, vii, axis=0).transpose(1, 2, 0)   # (K, D, Bp)
    vecs_t = vecs_t.astype(jnp.float32)

    # ---- VMEM accounting (sublane/lane padded, double-buffered) ------------
    in_buf = K * _round_up(D, 8) * tb * 4
    out_buf = 8 * _round_up(tb, 128) * 4
    vmem_est = 2 * in_buf + 2 * out_buf
    cp_kwargs = dict(dimension_semantics=("parallel",))
    if vmem_est > 12 * 1024 * 1024:     # would press v5e's 16 MiB scoped default
        cp_kwargs["vmem_limit_bytes"] = min(vmem_est + (4 << 20), 56 << 20)

    out2d = pl.pallas_call(
        sgns_kernel,
        out_shape=jax.ShapeDtypeStruct((1, Bp), jnp.float32),
        grid_spec=pltpu.PrefetchScalarGridSpec(
            num_scalar_prefetch=0,
            grid=(Bp // tb,),
            in_specs=[pl.BlockSpec((K, D, tb), lambda b: (0, 0, b))],
            out_specs=pl.BlockSpec((1, tb), lambda b: (0, b)),
        ),
        compiler_params=pltpu.CompilerParams(**cp_kwargs),
    )(vecs_t)
    return out2d[0, :B]


def sgns_reference(weights, vii):
    vecs = jnp.take(weights, vii.reshape(-1), axis=0).reshape(*vii.shape, -1)
    return jnp.sum(jnp.prod(vecs, axis=1), axis=-1)


if __name__ == "__main__":
    # Module defaults: nb_vecs=1000, nb_dims=50; weight ~ N(0, 0.01).
    V, D = 1000, 50
    key = jax.random.PRNGKey(0)
    kw, ki1, ki2 = jax.random.split(key, 3)
    weights = (0.01 * jax.random.normal(kw, (V, D))).astype(jnp.float32)

    # Test 1: module-like toy shape (16 index lists, 2 indices each) -> single tile.
    B1, K1 = 16, 2
    vii1 = jax.random.randint(ki1, (B1, K1), 0, V, dtype=jnp.int32)
    out1 = jax.block_until_ready(sgns_forward(weights, vii1))
    ref1 = jax.block_until_ready(sgns_reference(weights, vii1))
    assert out1.shape == (B1,) and out1.dtype == jnp.float32
    np.testing.assert_allclose(np.asarray(out1), np.asarray(ref1),
                               rtol=1e-5, atol=1e-7)

    # Test 2: multi-step grid with padding (exercises the 128-lane tiled path).
    B2, K2 = 300, 2
    vii2 = jax.random.randint(ki2, (B2, K2), 0, V, dtype=jnp.int32)
    out2 = jax.block_until_ready(sgns_forward(weights, vii2, tb=128))
    ref2 = jax.block_until_ready(sgns_reference(weights, vii2))
    assert out2.shape == (B2,) and out2.dtype == jnp.float32
    np.testing.assert_allclose(np.asarray(out2), np.asarray(ref2),
                               rtol=1e-5, atol=1e-7)

    print("KERNEL_OK")
</pallas_src>

<mosaic_0001>
module attributes {stable_mosaic.version = 11 : i64} {
  func.func @sgns_kernel(%arg0: i32, %arg1: memref<2x50x16xf32, #tpu.memory_space<vmem>>, %arg2: memref<1x16xf32, #tpu.memory_space<vmem>>) attributes {dimension_semantics = [#tpu.dimension_semantics<parallel>], iteration_bounds = array<i64: 1>, scalar_prefetch = 0 : i64, scratch_operands = 0 : i64, tpu.core_type = #tpu.core_type<tc>, window_params = [{transform_indices = @transform_0, window_bounds = array<i64: 2, 50, 16>}, {transform_indices = @transform_1, window_bounds = array<i64: 1, 16>}]} {
    %c0 = arith.constant 0 : index
    %c0_0 = arith.constant 0 : index
    %c0_1 = arith.constant 0 : index
    %0 = vector.load %arg1[%c0, %c0_0, %c0_1] : memref<2x50x16xf32, #tpu.memory_space<vmem>>, vector<1x50x16xf32>
    %1 = vector.shape_cast %0 : vector<1x50x16xf32> to vector<50x16xf32>
    %c1 = arith.constant 1 : index
    %c0_2 = arith.constant 0 : index
    %c0_3 = arith.constant 0 : index
    %2 = vector.load %arg1[%c1, %c0_2, %c0_3] : memref<2x50x16xf32, #tpu.memory_space<vmem>>, vector<1x50x16xf32>
    %3 = vector.shape_cast %2 : vector<1x50x16xf32> to vector<50x16xf32>
    %4 = arith.mulf %1, %3 : vector<50x16xf32>
    %cst = arith.constant dense<0.000000e+00> : vector<16xf32>
    %5 = vector.multi_reduction <add>, %4, %cst [0] : vector<50x16xf32> to vector<16xf32>
    %6 = vector.shape_cast %5 : vector<16xf32> to vector<1x16xf32>
    %c0_4 = arith.constant 0 : index
    %c0_5 = arith.constant 0 : index
    %7 = vector.load %arg2[%c0_4, %c0_5] : memref<1x16xf32, #tpu.memory_space<vmem>>, vector<1x16xf32>
    tpu.vector_store %arg2[%c0_4, %c0_5], %6 {strides = array<i32>} : memref<1x16xf32, #tpu.memory_space<vmem>>, vector<1x16xf32>,
    return
  }
  func.func @transform_0(%arg0: i32) -> (i32, i32, i32) {
    %c0_i32 = arith.constant 0 : i32
    %c0_i32_0 = arith.constant 0 : i32
    %c0_i32_1 = arith.constant 0 : i32
    return %c0_i32, %c0_i32_0, %arg0 : i32, i32, i32
  }
  func.func @transform_1(%arg0: i32) -> (i32, i32) {
    %c0_i32 = arith.constant 0 : i32
    %c0_i32_0 = arith.constant 0 : i32
    return %c0_i32, %arg0 : i32, i32
  }
}

</mosaic_0001>

<bundles_post_ra>
// kernel: tpu_custom_call.1
= control target key start
LH: loop header
LB: loop body
LE: loop exit
PB: predicated region body
PF: predicated region fallthrough
CT: control target
= control target key end

     0   :  { %vm31_vm0 = vcmask 130048   ;;  %s160_s0 = inlined_call_operand.vmem [shape: f32[2,50,16], index: 0, kind: input, shape index: {}]   ;;  %s161_s1 = inlined_call_operand.hbm [shape: f32[1,16], index: 1, kind: output, shape index: {}]  }
   0x1   :  { %v9_v0 = vld [vmem:[%s160_s0] sm:$0xff]  ;;  %v10_v1 = vld [vmem:[%s160_s0 + $0x8] sm:$0xff]  ;;  %v11_v2 = vld [vmem:[%s160_s0 + $0x10] sm:$0xff] }
   0x2   :  { %v12_v3 = vld [vmem:[%s160_s0 + $0x18] sm:$0xff]  ;;  %v13_v4 = vld [vmem:[%s160_s0 + $0x20] sm:$0xff]  ;;  %v70_v7 = vld [vmem:[%s160_s0 + $0x48] sm:$0xff] }
   0x3   :  { %v68_v5 = vld [vmem:[%s160_s0 + $0x38] sm:$0xff]  ;;  %v69_v6 = vld [vmem:[%s160_s0 + $0x40] sm:$0xff]  ;;  %v71_v8 = vld [vmem:[%s160_s0 + $0x50] sm:$0xff]  ;;  %v26_v14 = vmul.f32 %v70_v7, %v11_v2 }
   0x4   :  { %v72_v9 = vld [vmem:[%s160_s0 + $0x58] sm:$0xff]  ;;  %v24_v10 = vmul.f32 %v68_v5, %v9_v0  ;;  %v25_v11 = vmul.f32 %v69_v6, %v10_v1  ;;  %v14_v12 = vld [vmem:[%s160_s0 + $0x28] sm:$0xff]  ;;  %v73_v13 = vld [vmem:[%s160_s0 + $0x60] sm:$0xff]  ;;  %v27_v15 = vmul.f32 %v71_v8, %v12_v3 }
   0x5   :  { %6 = vsyncpa [#allocation3], 0  ;;  %v28_v16 = vmul.f32 %v72_v9, %v13_v4  ;;  %v15_v19 = vld [vmem:[%s160_s0 + $0x30] sm:$0x3]  ;;  %v74_v20 = vld [vmem:[%s160_s0 + $0x68] sm:$0x3]  ;;  %v29_v23 = vmul.f32 %v73_v13, %v14_v12 }
   0x6   :  { %v32_v17 = vsel %vm31_vm0, %v24_v10, 0.0  ;;  %v33_v18 = vsel %vm31_vm0, %v25_v11, 0.0  ;;  %v35_v22 = vsel %vm31_vm0, %v26_v14, 0.0  ;;  %v37_v24 = vsel %vm31_vm0, %v27_v15, 0.0  ;;  %s98_s0 = smov [#allocation2]  }
   0x7   :  { %v34_v21 = vadd.f32 %v33_v18, %v32_v17  ;;  %v30_v26 = vmul.f32 %v74_v20, %v15_v19  ;;  %v39_v27 = vsel %vm31_vm0, %v28_v16, 0.0  ;;  %vm43_vm1 = vcmask 123904   ;;  %s60_s5 = sshll.u32 %s98_s0, 4  ;;  %s61_s5 = int_to_ptr.vmem [resolvable:$true] %s60_s5 }
   0x8   :  { %v41_v29 = vsel %vm31_vm0, %v29_v23, 0.0  ;;  %vm52_vm2 = vcmask 122880   ;;  %s76_s6 = scalar_lea.vmem %s61_s5, 16  ;;  %s80_s7 = scalar_lea.vmem %s61_s5, 32 }
   0x9   :  { %v36_v25 = vadd.f32 %v35_v22, %v34_v21  ;;  %v44_v31 = vsel %vm43_vm1, %v30_v26, 0.0  ;;  %p77_p0 = scmp.ne.s32.totalorder %s61_s5, %s76_s6  ;;  %p81_p1 = scmp.lt.s32.totalorder %s61_s5, %s61_s5 }
   0xa   :  { %p82_p2 = scmp.lt.s32.totalorder %s80_s7, %s76_s6 }
   0xb   :  { %v38_v28 = vadd.f32 %v37_v24, %v36_v25 }
   0xc   :  { %p83_p3 = por %p82_p2, %p81_p1 }
   0xd   :  { %v40_v30 = vadd.f32 %v39_v27, %v38_v28 }
   0xe   :  { %p84_p4 = pnand %p83_p3, %p77_p0 }
   0xf   :  { %v42_v32 = vadd.f32 %v41_v29, %v40_v30 }
  0x11   :  { %v45_v33 = vadd.f32 %v44_v31, %v42_v32 }
  0x13   :  { %v46_v34 = vrot.slane %v45_v33, 4 }
  0x15   :  { %v47_v35 = vadd.f32 %v46_v34, %v45_v33 }
  0x17   :  { %v48_v36 = vrot.slane %v47_v35, 2 }
  0x19   :  { %v49_v37 = vadd.f32 %v48_v36, %v47_v35 }
  0x1b   :  { %v50_v38 = vrot.slane %v49_v37, 1 }
  0x1d   :  { %v51_v39 = vadd.f32 %v50_v38, %v49_v37 }
  0x1f   :  { %53 = vst.msk [vmem:[#allocation2] sm:$0x1] %vm52_vm2, %v51_v39 }
  0x20   :  { %87 = shalt.err (!%p84_p4)
}
  0x21   :  { %63 = dma.vmem_to_hbm [thread:$0]  %s61_s5, 16, %s161_s1, [#allocation3]  }
  0x22   :  { %96 = dma.done.wait [#allocation3], 16  }
  0x23   :  { %97 = vsyncadd [#allocation3], 4294967280 }
  0x24   :  { %67 = vsyncpa [#allocation3], 1 }

</bundles_post_ra>
